<compile_context>
chip_gen: v5e
topology: v5e:2x2
jax: 0.10.0
libtpu: 0.0.40
codegen_flags: <defaults>
</compile_context>

<pallas_src>
import functools

import jax
import jax.numpy as jnp
from jax.experimental import pallas as pl
from jax.experimental.pallas import tpu as pltpu


def _round_up(x, m):
    return ((x + m - 1) // m) * m


def _cdiv(a, b):
    return (a + b - 1) // b


def _cnn_kernel(max_fs, emb_ref, wconv_ref, wfc_ref, bconv_ref, bfc_ref,
                mask_ref, out_ref):
    """Fused conv (shifted matmuls) + ReLU + masked max-pool + fc.

    emb_ref   : [TB, S_pad, D]        bf16
    wconv_ref : [max_fs, D, N_conv]   bf16  (merged, zero-padded conv weights)
    wfc_ref   : [N_conv, N_out]       bf16
    bconv_ref : [1, N_conv]           f32
    bfc_ref   : [1, N_out]            f32
    mask_ref  : [L_pad, N_conv]       f32   (0 = valid window position, -1e30 = invalid)
    out_ref   : [TB, N_out]           f32
    """
    TB, S_pad, D = emb_ref.shape
    L_pad, N_conv = mask_ref.shape

    emb = emb_ref[...]                                       # [TB, S_pad, D] bf16
    # Conv as max_fs shifted matmuls (K = D each), f32 accumulation.  No window
    # tensor / lane-axis concat is materialized.
    acc = jnp.zeros((TB * L_pad, N_conv), jnp.float32)
    for k in range(max_fs):                                  # static, tiny trip count
        x_k = emb[:, k:k + L_pad, :].reshape(TB * L_pad, D)
        acc = acc + jnp.dot(x_k, wconv_ref[k],
                            preferred_element_type=jnp.float32)

    conv = jnp.maximum(acc + bconv_ref[...], 0.0)            # bias + ReLU (f32)
    # Additive -inf-style mask on invalid window positions, then global max-pool.
    conv = conv.reshape(TB, L_pad, N_conv) + mask_ref[...][None, :, :]
    pooled = jnp.max(conv, axis=1)                           # [TB, N_conv] f32

    # TODO(synk): nn.Dropout is identity in eval mode; training-mode masking not implemented.
    out = jnp.dot(pooled.astype(wfc_ref.dtype), wfc_ref[...],
                  preferred_element_type=jnp.float32) + bfc_ref[...]
    out_ref[...] = out.astype(out_ref.dtype)


def cnn_forward_pallas(text, emb_table, conv_ws, conv_bs, fc_w, fc_b,
                       filter_sizes, output_dim):
    """Forward pass of the PyTorch CNN module (eval mode).

    text      : [seq_len, batch] int tokens (permuted to [batch, seq_len], as in PyTorch).
    emb_table : [vocab, D] f32
    conv_ws[i]: [n_filters, fs_i, D]  (Conv2d weight with the in-channel dim squeezed)
    conv_bs[i]: [n_filters]
    fc_w      : [output_dim, len(filter_sizes)*n_filters]  (PyTorch Linear layout)
    fc_b      : [output_dim]
    """
    tokens = text.T                                          # [B, S]
    B, S = tokens.shape
    D = emb_table.shape[1]
    n_fs = len(filter_sizes)
    n_filters = conv_ws[0].shape[0]
    max_fs = max(filter_sizes)
    min_fs = min(filter_sizes)
    assert S >= max_fs, "sequence must be at least as long as the widest filter"

    L_max = S - min_fs + 1
    L_pad = _round_up(L_max, 8)                  # window positions -> whole sublanes
    S_pad = _round_up(L_pad + max_fs - 1, 8)     # every shifted slice stays in-bounds
    N_conv = _round_up(n_fs * n_filters, 128)    # conv-out / fc-in lanes
    N_out = _round_up(output_dim, 128)           # fc-out lanes
    assert n_fs * n_filters <= N_conv and output_dim <= N_out

    # ---- batch tile: fill an MXU pass (M = TB*L_pad), whole-sublane stores ----
    TB = max(8, _round_up(_cdiv(256, L_pad), 8))
    # Cap by a per-step VMEM budget that also fits v7x (64 MiB physical VMEM).
    vmem_budget = 40 * 1024 * 1024

    def _tile_bytes(tb):
        return (2 * tb * S_pad * D * 2           # double-buffered bf16 activations
                + 2 * tb * N_out * 4             # double-buffered f32 output
                + 3 * tb * L_pad * N_conv * 4)   # f32 conv accumulator/intermediate + slack

    while TB > 8 and _tile_bytes(TB) > vmem_budget:
        TB -= 8
    B8 = _round_up(B, 8)
    TB = min(TB, B8)
    # v7x megacore: prefer >=2 grid steps (both TensorCores busy) when batch allows.
    if _round_up(B8, TB) // TB < 2 and TB >= 16:
        TB = max(8, 8 * (TB // 16))
    B_pad = _round_up(B8, TB)
    grid = (B_pad // TB,)

    # ---- trace-time weight packing (free; outside the kernel) ----
    w_conv = jnp.zeros((max_fs, D, N_conv), jnp.float32)
    b_conv = jnp.zeros((1, N_conv), jnp.float32)
    mask = jnp.zeros((L_pad, N_conv), jnp.float32)
    NEG = jnp.float32(-1e30)
    for i, (fs, w, b) in enumerate(zip(filter_sizes, conv_ws, conv_bs)):
        col = slice(i * n_filters, (i + 1) * n_filters)
        # [n_filters, fs, D] -> [fs, D, n_filters]
        w_conv = w_conv.at[:fs, :, col].set(jnp.transpose(w, (1, 2, 0)))
        b_conv = b_conv.at[0, col].set(b)
        valid = S - fs + 1
        mask = mask.at[valid:, col].set(NEG)     # invalid window positions for this filter

    w_fc = jnp.zeros((N_conv, N_out), jnp.float32)
    w_fc = w_fc.at[:n_fs * n_filters, :output_dim].set(fc_w.T)
    b_fc = jnp.zeros((1, N_out), jnp.float32).at[0, :output_dim].set(fc_b)

    w_conv = w_conv.astype(jnp.bfloat16)
    w_fc = w_fc.astype(jnp.bfloat16)

    # ---- embedding gather straight into the padded bf16 activation layout ----
    # Padding token id 0 is safe: padded seq rows only feed masked window positions
    # and padded batch rows are sliced off below.
    tok_p = jnp.zeros((B_pad, S_pad), tokens.dtype).at[:B, :S].set(tokens)
    emb_p = jnp.take(emb_table.astype(jnp.bfloat16), tok_p, axis=0)   # [B_pad, S_pad, D]
    # TODO(synk): for production sizes, fuse this gather into the kernel via
    # scalar-prefetched token ids / manual DMA instead of materializing emb_p in HBM.

    kernel = functools.partial(_cnn_kernel, max_fs)
    out = pl.pallas_call(
        kernel,
        out_shape=jax.ShapeDtypeStruct((B_pad, N_out), jnp.float32),
        grid=grid,
        in_specs=[
            pl.BlockSpec((TB, S_pad, D), lambda i: (i, 0, 0)),        # batch-tiled activations
            pl.BlockSpec((max_fs, D, N_conv), lambda i: (0, 0, 0)),   # resident conv weights
            pl.BlockSpec((N_conv, N_out), lambda i: (0, 0)),          # resident fc weight
            pl.BlockSpec((1, N_conv), lambda i: (0, 0)),              # conv bias
            pl.BlockSpec((1, N_out), lambda i: (0, 0)),               # fc bias
            pl.BlockSpec((L_pad, N_conv), lambda i: (0, 0)),          # validity mask
        ],
        out_specs=pl.BlockSpec((TB, N_out), lambda i: (i, 0)),
        compiler_params=pltpu.CompilerParams(
            dimension_semantics=("parallel",),
            vmem_limit_bytes=48 * 1024 * 1024,
        ),
    )(emb_p, w_conv, w_fc, b_conv, b_fc, mask)

    return out[:B, :output_dim]


def cnn_forward_ref(embedded, conv_ws, conv_bs, fc_w, fc_b, filter_sizes):
    """Pure-JAX f32 reference of the PyTorch forward (eval mode)."""
    B, S, D = embedded.shape
    n_filters = conv_ws[0].shape[0]
    pooled = []
    for w, b, fs in zip(conv_ws, conv_bs, filter_sizes):
        L = S - fs + 1
        win = jnp.concatenate([embedded[:, k:k + L, :] for k in range(fs)], axis=-1)
        w2 = w.reshape(n_filters, fs * D).T
        conv = jnp.einsum("bld,df->blf", win, w2) + b
        conv = jnp.maximum(conv, 0.0)
        pooled.append(jnp.max(conv, axis=1))
    cat = jnp.concatenate(pooled, axis=-1)
    return cat @ fc_w.T + fc_b


if __name__ == "__main__":
    # Module hyper-parameters (small, consistent with CNN.__init__).
    vocab_size = 50
    embedding_dim = 32
    n_filters = 8
    filter_sizes = (2, 3, 4)
    output_dim = 5
    batch = 2
    seq_len = 8

    key = jax.random.PRNGKey(0)
    k_emb, k_text, k_fc, *k_convs = jax.random.split(key, 3 + len(filter_sizes))

    # Deterministic synthetic parameters (PyTorch layouts).
    emb_table = jax.random.normal(k_emb, (vocab_size, embedding_dim), jnp.float32) * 0.1

    conv_ws, conv_bs = [], []
    for i, fs in enumerate(filter_sizes):
        kw, kb = jax.random.split(k_convs[i])
        # Conv2d weight [n_filters, 1, fs, D] with the in-channel dim squeezed.
        conv_ws.append(jax.random.normal(kw, (n_filters, fs, embedding_dim), jnp.float32) * 0.1)
        conv_bs.append(jax.random.normal(kb, (n_filters,), jnp.float32) * 0.1)

    kfw, kfb = jax.random.split(k_fc)
    fc_in = len(filter_sizes) * n_filters
    fc_w = jax.random.normal(kfw, (output_dim, fc_in), jnp.float32) * 0.1   # Linear layout
    fc_b = jax.random.normal(kfb, (output_dim,), jnp.float32) * 0.1

    # text: [seq_len, batch] int tokens, permuted inside forward -> [batch, seq_len].
    text = jax.random.randint(k_text, (seq_len, batch), 0, vocab_size, jnp.int32)

    out = cnn_forward_pallas(text, emb_table, conv_ws, conv_bs, fc_w, fc_b,
                             filter_sizes, output_dim)
    out = jax.block_until_ready(out)

    # Reference path: f32 embedding lookup + f32 convs.
    embedded = jnp.take(emb_table, text.T, axis=0)      # [batch, seq_len, embedding_dim]
    ref = cnn_forward_ref(embedded, conv_ws, conv_bs, fc_w, fc_b, filter_sizes)

    assert out.shape == (batch, output_dim)
    # bf16 matmul operands => looser tolerance than pure f32.
    assert jnp.allclose(out, ref, atol=2e-2, rtol=2e-2), "Pallas output mismatch vs JAX reference"

    print("KERNEL_OK")
</pallas_src>

<mosaic_0001>
module attributes {stable_mosaic.version = 11 : i64} {
  func.func @_cnn_kernel(%arg0: i32, %arg1: memref<8x16x32xbf16, #tpu.memory_space<vmem>>, %arg2: memref<4x32x128xbf16, #tpu.memory_space<vmem>>, %arg3: memref<128x128xbf16, #tpu.memory_space<vmem>>, %arg4: memref<1x128xf32, #tpu.memory_space<vmem>>, %arg5: memref<1x128xf32, #tpu.memory_space<vmem>>, %arg6: memref<8x128xf32, #tpu.memory_space<vmem>>, %arg7: memref<8x128xf32, #tpu.memory_space<vmem>>) attributes {dimension_semantics = [#tpu.dimension_semantics<parallel>], iteration_bounds = array<i64: 1>, scalar_prefetch = 0 : i64, scratch_operands = 0 : i64, tpu.core_type = #tpu.core_type<tc>, window_params = [{transform_indices = @transform_0, window_bounds = array<i64: 8, 16, 32>}, {pipeline_mode = #tpu.pipeline_mode<synchronous>, transform_indices = @transform_1, window_bounds = array<i64: 4, 32, 128>}, {pipeline_mode = #tpu.pipeline_mode<synchronous>, transform_indices = @transform_2, window_bounds = array<i64: 128, 128>}, {pipeline_mode = #tpu.pipeline_mode<synchronous>, transform_indices = @transform_3, window_bounds = array<i64: 1, 128>}, {pipeline_mode = #tpu.pipeline_mode<synchronous>, transform_indices = @transform_4, window_bounds = array<i64: 1, 128>}, {pipeline_mode = #tpu.pipeline_mode<synchronous>, transform_indices = @transform_5, window_bounds = array<i64: 8, 128>}, {transform_indices = @transform_6, window_bounds = array<i64: 8, 128>}]} {
    %c0 = arith.constant 0 : index
    %c0_0 = arith.constant 0 : index
    %c0_1 = arith.constant 0 : index
    %0 = vector.load %arg1[%c0, %c0_0, %c0_1] : memref<8x16x32xbf16, #tpu.memory_space<vmem>>, vector<8x16x32xbf16>
    %cst = arith.constant 0.000000e+00 : f32
    %1 = vector.broadcast %cst : f32 to vector<64x128xf32>
    %2 = vector.extract_strided_slice %0 {offsets = [0, 0, 0], sizes = [8, 8, 32], strides = [1, 1, 1]} : vector<8x16x32xbf16> to vector<8x8x32xbf16>
    %3 = vector.shape_cast %2 : vector<8x8x32xbf16> to vector<64x32xbf16>
    %c0_2 = arith.constant 0 : index
    %c0_3 = arith.constant 0 : index
    %c0_4 = arith.constant 0 : index
    %4 = vector.load %arg2[%c0_2, %c0_3, %c0_4] : memref<4x32x128xbf16, #tpu.memory_space<vmem>>, vector<1x32x128xbf16>
    %5 = vector.shape_cast %4 : vector<1x32x128xbf16> to vector<32x128xbf16>
    %cst_5 = arith.constant dense<0.000000e+00> : vector<64x128xf32>
    %6 = tpu.matmul %3, %5, %cst_5 {dimension_numbers = #tpu.dot_dimension_numbers<[1], [0], [0], [1], [0, 0, 1, 1], [], []>} : vector<64x32xbf16>, vector<32x128xbf16>, vector<64x128xf32> -> vector<64x128xf32>
    %7 = arith.addf %1, %6 : vector<64x128xf32>
    %8 = vector.extract_strided_slice %0 {offsets = [0, 1, 0], sizes = [8, 8, 32], strides = [1, 1, 1]} : vector<8x16x32xbf16> to vector<8x8x32xbf16>
    %9 = vector.shape_cast %8 : vector<8x8x32xbf16> to vector<64x32xbf16>
    %c1 = arith.constant 1 : index
    %c0_6 = arith.constant 0 : index
    %c0_7 = arith.constant 0 : index
    %10 = vector.load %arg2[%c1, %c0_6, %c0_7] : memref<4x32x128xbf16, #tpu.memory_space<vmem>>, vector<1x32x128xbf16>
    %11 = vector.shape_cast %10 : vector<1x32x128xbf16> to vector<32x128xbf16>
    %cst_8 = arith.constant dense<0.000000e+00> : vector<64x128xf32>
    %12 = tpu.matmul %9, %11, %cst_8 {dimension_numbers = #tpu.dot_dimension_numbers<[1], [0], [0], [1], [0, 0, 1, 1], [], []>} : vector<64x32xbf16>, vector<32x128xbf16>, vector<64x128xf32> -> vector<64x128xf32>
    %13 = arith.addf %7, %12 : vector<64x128xf32>
    %14 = vector.extract_strided_slice %0 {offsets = [0, 2, 0], sizes = [8, 8, 32], strides = [1, 1, 1]} : vector<8x16x32xbf16> to vector<8x8x32xbf16>
    %15 = vector.shape_cast %14 : vector<8x8x32xbf16> to vector<64x32xbf16>
    %c2 = arith.constant 2 : index
    %c0_9 = arith.constant 0 : index
    %c0_10 = arith.constant 0 : index
    %16 = vector.load %arg2[%c2, %c0_9, %c0_10] : memref<4x32x128xbf16, #tpu.memory_space<vmem>>, vector<1x32x128xbf16>
    %17 = vector.shape_cast %16 : vector<1x32x128xbf16> to vector<32x128xbf16>
    %cst_11 = arith.constant dense<0.000000e+00> : vector<64x128xf32>
    %18 = tpu.matmul %15, %17, %cst_11 {dimension_numbers = #tpu.dot_dimension_numbers<[1], [0], [0], [1], [0, 0, 1, 1], [], []>} : vector<64x32xbf16>, vector<32x128xbf16>, vector<64x128xf32> -> vector<64x128xf32>
    %19 = arith.addf %13, %18 : vector<64x128xf32>
    %20 = vector.extract_strided_slice %0 {offsets = [0, 3, 0], sizes = [8, 8, 32], strides = [1, 1, 1]} : vector<8x16x32xbf16> to vector<8x8x32xbf16>
    %21 = vector.shape_cast %20 : vector<8x8x32xbf16> to vector<64x32xbf16>
    %c3 = arith.constant 3 : index
    %c0_12 = arith.constant 0 : index
    %c0_13 = arith.constant 0 : index
    %22 = vector.load %arg2[%c3, %c0_12, %c0_13] : memref<4x32x128xbf16, #tpu.memory_space<vmem>>, vector<1x32x128xbf16>
    %23 = vector.shape_cast %22 : vector<1x32x128xbf16> to vector<32x128xbf16>
    %cst_14 = arith.constant dense<0.000000e+00> : vector<64x128xf32>
    %24 = tpu.matmul %21, %23, %cst_14 {dimension_numbers = #tpu.dot_dimension_numbers<[1], [0], [0], [1], [0, 0, 1, 1], [], []>} : vector<64x32xbf16>, vector<32x128xbf16>, vector<64x128xf32> -> vector<64x128xf32>
    %25 = arith.addf %19, %24 : vector<64x128xf32>
    %c0_15 = arith.constant 0 : index
    %c0_16 = arith.constant 0 : index
    %26 = vector.load %arg4[%c0_15, %c0_16] : memref<1x128xf32, #tpu.memory_space<vmem>>, vector<1x128xf32>
    %27 = vector.broadcast %26 : vector<1x128xf32> to vector<64x128xf32>
    %28 = arith.addf %25, %27 : vector<64x128xf32>
    %cst_17 = arith.constant 0.000000e+00 : f32
    %29 = vector.broadcast %cst_17 : f32 to vector<64x128xf32>
    %30 = arith.maximumf %28, %29 : vector<64x128xf32>
    %31 = vector.shape_cast %30 : vector<64x128xf32> to vector<8x8x128xf32>
    %c0_18 = arith.constant 0 : index
    %c0_19 = arith.constant 0 : index
    %32 = vector.load %arg6[%c0_18, %c0_19] : memref<8x128xf32, #tpu.memory_space<vmem>>, vector<8x128xf32>
    %33 = vector.shape_cast %32 : vector<8x128xf32> to vector<1x8x128xf32>
    %34 = vector.broadcast %33 : vector<1x8x128xf32> to vector<8x8x128xf32>
    %35 = arith.addf %31, %34 : vector<8x8x128xf32>
    %cst_20 = arith.constant dense<0xFF800000> : vector<8x128xf32>
    %36 = vector.multi_reduction <maximumf>, %35, %cst_20 [1] : vector<8x8x128xf32> to vector<8x128xf32>
    %37 = arith.truncf %36 : vector<8x128xf32> to vector<8x128xbf16>
    %c0_21 = arith.constant 0 : index
    %c0_22 = arith.constant 0 : index
    %38 = vector.load %arg3[%c0_21, %c0_22] : memref<128x128xbf16, #tpu.memory_space<vmem>>, vector<128x128xbf16>
    %cst_23 = arith.constant dense<0.000000e+00> : vector<8x128xf32>
    %39 = tpu.matmul %37, %38, %cst_23 {dimension_numbers = #tpu.dot_dimension_numbers<[1], [0], [0], [1], [0, 0, 1, 1], [], []>} : vector<8x128xbf16>, vector<128x128xbf16>, vector<8x128xf32> -> vector<8x128xf32>
    %c0_24 = arith.constant 0 : index
    %c0_25 = arith.constant 0 : index
    %40 = vector.load %arg5[%c0_24, %c0_25] : memref<1x128xf32, #tpu.memory_space<vmem>>, vector<1x128xf32>
    %41 = vector.broadcast %40 : vector<1x128xf32> to vector<8x128xf32>
    %42 = arith.addf %39, %41 : vector<8x128xf32>
    %c0_26 = arith.constant 0 : index
    %c0_27 = arith.constant 0 : index
    %43 = vector.load %arg7[%c0_26, %c0_27] : memref<8x128xf32, #tpu.memory_space<vmem>>, vector<8x128xf32>
    tpu.vector_store %arg7[%c0_26, %c0_27], %42 {strides = array<i32>} : memref<8x128xf32, #tpu.memory_space<vmem>>, vector<8x128xf32>,
    return
  }
  func.func @transform_0(%arg0: i32) -> (i32, i32, i32) {
    %c0_i32 = arith.constant 0 : i32
    %c0_i32_0 = arith.constant 0 : i32
    %c0_i32_1 = arith.constant 0 : i32
    return %arg0, %c0_i32, %c0_i32_0 : i32, i32, i32
  }
  func.func @transform_1(%arg0: i32) -> (i32, i32, i32) {
    %c0_i32 = arith.constant 0 : i32
    %c0_i32_0 = arith.constant 0 : i32
    %c0_i32_1 = arith.constant 0 : i32
    %c0_i32_2 = arith.constant 0 : i32
    return %c0_i32, %c0_i32_0, %c0_i32_1 : i32, i32, i32
  }
  func.func @transform_2(%arg0: i32) -> (i32, i32) {
    %c0_i32 = arith.constant 0 : i32
    %c0_i32_0 = arith.constant 0 : i32
    %c0_i32_1 = arith.constant 0 : i32
    return %c0_i32, %c0_i32_0 : i32, i32
  }
  func.func @transform_3(%arg0: i32) -> (i32, i32) {
    %c0_i32 = arith.constant 0 : i32
    %c0_i32_0 = arith.constant 0 : i32
    %c0_i32_1 = arith.constant 0 : i32
    return %c0_i32, %c0_i32_0 : i32, i32
  }
  func.func @transform_4(%arg0: i32) -> (i32, i32) {
    %c0_i32 = arith.constant 0 : i32
    %c0_i32_0 = arith.constant 0 : i32
    %c0_i32_1 = arith.constant 0 : i32
    return %c0_i32, %c0_i32_0 : i32, i32
  }
  func.func @transform_5(%arg0: i32) -> (i32, i32) {
    %c0_i32 = arith.constant 0 : i32
    %c0_i32_0 = arith.constant 0 : i32
    %c0_i32_1 = arith.constant 0 : i32
    return %c0_i32, %c0_i32_0 : i32, i32
  }
  func.func @transform_6(%arg0: i32) -> (i32, i32) {
    %c0_i32 = arith.constant 0 : i32
    %c0_i32_0 = arith.constant 0 : i32
    return %arg0, %c0_i32 : i32, i32
  }
}

</mosaic_0001>

<bundles_post_ra>
// kernel: tpu_custom_call.1
= control target key start
LH: loop header
LB: loop body
LE: loop exit
PB: predicated region body
PF: predicated region fallthrough
CT: control target
= control target key end

     0   :  { %11 = vsyncpa [#allocation3], 0  ;;  %s1301_s0 = inlined_call_operand.hbm [shape: bf16[8,16,32], index: 0, kind: input, shape index: {}]   ;;  %s1302_s1 = inlined_call_operand.hbm [shape: bf16[4,32,128], index: 1, kind: input, shape index: {}]   ;;  %s1303_s2 = inlined_call_operand.hbm [shape: bf16[128,128], index: 2, kind: input, shape index: {}]   ;;  %s1304_s3 = inlined_call_operand.vmem [shape: f32[1,128], index: 3, kind: input, shape index: {}]   ;;  %s1305_s4 = inlined_call_operand.vmem [shape: f32[1,128], index: 4, kind: input, shape index: {}]   ;;  %s1306_s5 = inlined_call_operand.hbm [shape: f32[8,128], index: 5, kind: input, shape index: {}]   ;;  %s1307_s6 = inlined_call_operand.hbm [shape: f32[8,128], index: 6, kind: output, shape index: {}]  }
   0x1   :  { %12 = vsyncpa [#allocation6], 0 }
   0x2   :  { %13 = vsyncpa [#allocation9], 0 }
   0x3   :  { %14 = vsyncpa [#allocation4], 0  ;;  %s32_s23 = sshll.u32 %s1302_s1, 4  ;;  %s1126_s24 = smov [#allocation5]   ;;  %s33_s23 = int_to_ptr.hbm [resolvable:$true] %s32_s23 }
   0x4   :  { %s34_s25 = sshll.u32 %s1126_s24, 4  ;;  %s19_s28 = sshll.u32 %s1301_s0, 4  ;;  %s35_s25 = int_to_ptr.vmem [resolvable:$true] %s34_s25  ;;  %s20_s28 = int_to_ptr.hbm [resolvable:$true] %s19_s28 }
   0x5   :  { %s1127_s29 = smov 64   ;;  %s1128_s30 = smov 4  }
   0x6   :  { %40 = dma.hbm_to_vmem [thread:$0]  %s33_s23, 1024, %s35_s25, [#allocation6], %s1127_s29, %s1127_s29, %s1128_s30  }
   0x7   :  { %s1129_s7 = smov [#allocation2]   ;;  %s45_s11 = sshll.u32 %s1303_s2, 4  ;;  %s46_s11 = int_to_ptr.hbm [resolvable:$true] %s45_s11 }
   0x8   :  { %s21_s8 = sshll.u32 %s1129_s7, 4  ;;  %s63_s13 = sshll.u32 %s1306_s5, 4  ;;  %s22_s8 = int_to_ptr.vmem [resolvable:$true] %s21_s8  ;;  %s64_s13 = int_to_ptr.hbm [resolvable:$true] %s63_s13 }
   0x9   :  { %27 = dma.hbm_to_vmem [thread:$0]  %s20_s28, 1024, %s22_s8, [#allocation3], %s1127_s29, %s1127_s29, %s1128_s30  }
   0xa   :  { %s1130_s14 = smov [#allocation7]   ;;  %s1131_s0 = smov [#allocation8]  }
   0xb   :  { %s47_s15 = sshll.u32 %s1130_s14, 4  ;;  %s65_s16 = sshll.u32 %s1131_s0, 4  ;;  %s48_s15 = int_to_ptr.vmem [resolvable:$true] %s47_s15  ;;  %s66_s16 = int_to_ptr.vmem [resolvable:$true] %s65_s16 }
   0xc   :  { %53 = dma.hbm_to_vmem [thread:$0]  %s46_s11, 1024, %s48_s15, [#allocation6], %s1127_s29, %s1127_s29, %s1128_s30  }
   0xd   :  { %68 = dma.hbm_to_vmem [thread:$0]  %s64_s13, 128, %s66_s16, [#allocation9]  }
   0xe   :  { %1118 = dma.done.wait [#allocation3], 1024  }
   0xf   :  { %1119 = vsyncadd [#allocation3], 4294966272 }
  0x10   :  { %1120 = dma.done.wait [#allocation6], 2048  }
  0x11   :  { %1121 = vsyncadd [#allocation6], 4294965248 }
  0x12   :  { %1122 = dma.done.wait [#allocation9], 128  }
  0x13   :  { %1123 = vsyncadd [#allocation9], 4294967168  ;;  %vm373_vm0 = vcmask 1042432   ;;  %vm374_vm1 = vcmask 1046532   ;;  %v974_v1 = vld [vmem:[#allocation5 + $0x8] sm:$0xff]  ;;  %v976_v3 = vld [vmem:[#allocation5 + $0x18] sm:$0xff] }
  0x14   :  { %vm1180_vm2 = vmor %vm373_vm0, %vm374_vm1  ;;  %v978_v2 = vld [vmem:[#allocation5 + $0x28] sm:$0xff]  ;;  %vm106_vm3 = vsmask.f32 3328  ;;  %v973_v4 = vld [vmem:[#allocation5] sm:$0xff]  ;;  %vm250_vm4 = vcmask 261120   ;;  %342 = vmatpush.bf16.msra.mxu1 %v974_v1  ;;  %269 = vmatpush.bf16.msra.mxu0 %v976_v3  ;;  %vm768_vm10 = vcmask 1041409  }
  0x15   :  { %v977_v5 = vld [vmem:[#allocation5 + $0x20] sm:$0xff]  ;;  %v980_v6 = vld [vmem:[#allocation5 + $0x38] sm:$0xff]  ;;  %vm107_vm5 = vsmask.f32 7440  ;;  %455 = vmatpush.bf16.msra.mxu2 %v978_v2  ;;  %v969_v8 = vld [vmem:[#allocation2 + $0x4] sm:$0xf0] }
  0x16   :  { %v879_v7 = vld [vmem:[#allocation2] sm:$0xf]  ;;  %vm486_vm6 = vsmask.f32 2304  ;;  %vm487_vm7 = vsmask.f32 6416  ;;  %616 = vmatpush.bf16.msra.mxu3 %v980_v6  ;;  %vm1195_vm8 = vmor %vm106_vm3, %vm107_vm5 }
  0x17   :  { %v86_v9 = vld [vmem:[#allocation2] sm:$0xf]  ;;  %v880_v10 = vor.u32 %v969_v8, %v879_v7  ;;  %v87_v11 = vld [vmem:[#allocation2 + $0x4] sm:$0xf]  ;;  %v88_v12 = vld [vmem:[#allocation2 + $0x8] sm:$0xf] }
  0x18   :  { %v89_v13 = vld [vmem:[#allocation2 + $0xc] sm:$0xf]  ;;  %v905_v14 = vrot.slane %v86_v9, 9  ;;  %v378_v15 = vrot.slane %v87_v11, 5  ;;  %v906_v16 = vrot.slane %v88_v12, 9  ;;  %v975_v18 = vld [vmem:[#allocation5 + $0x10] sm:$0xff]  ;;  %343 = vmatpush.bf16.msra.mxu1 %v973_v4  ;;  %vm1206_vm9 = vmor %vm486_vm6, %vm487_vm7 }
  0x19   :  { %v382_v17 = vrot.slane %v89_v13, 5  ;;  %v979_v19 = vld [vmem:[#allocation5 + $0x30] sm:$0xff]  ;;  %v110_v20 = vshrl.u32 %v86_v9, 16  ;;  %v113_v21 = vshll.u32 %v86_v9, 16  ;;  %v119_v22 = vshll.u32 %v87_v11, 16  ;;  %456 = vmatpush.bf16.msra.mxu2 %v977_v5  ;;  %270 = vmatpush.bf16.msra.mxu0 %v975_v18  ;;  %v988_v59 = vld [vmem:[#allocation7 + $0x38] sm:$0xff] }
  0x1a   :  { %v124_v23 = vshrl.u32 %v88_v12, 16  ;;  %v379_v24 = vsel %vm1180_vm2, %v905_v14, %v378_v15  ;;  %v127_v26 = vshll.u32 %v88_v12, 16  ;;  %v133_v27 = vshll.u32 %v89_v13, 16  ;;  %617 = vmatpush.bf16.msra.mxu3 %v979_v19  ;;  %v1189_v40 = vld [vmem:[#allocation2 + $0x10] sm:$0xf]  ;;  %s1132_s18 = smov [#allocation10]  }
  0x1b   :  { %v383_v25 = vsel %vm1180_vm2, %v906_v16, %v382_v17  ;;  %v413_v28 = vunpack.c.l.b16 %v379_v24  ;;  %v112_v30 = vrot.slane %v110_v20, 4  ;;  %v115_v31 = vrot.slane %v113_v21, 5  ;;  %901 = vmatmul.msk.bf16.vlgmr.msra.gmra.mxu1 %vm250_vm4, %v880_v10  ;;  %v1191_v41 = vld [vmem:[#allocation2 + $0x14] sm:$0xf0]  ;;  %v90_v47 = vld [vmem:[#allocation2 + $0x10] sm:$0xf] }
  0x1c   :  { %v414_v29 = vunpack.c.l.b16 %v383_v25  ;;  %v121_v32 = vrot.slane %v119_v22, 5  ;;  %v126_v33 = vrot.slane %v124_v23, 4  ;;  %v129_v34 = vrot.slane %v127_v26, 5  ;;  %v91_v52 = vld [vmem:[#allocation2 + $0x14] sm:$0xf]  ;;  %s851_s19 = sshll.u32 %s1132_s18, 4  ;;  %s852_s19 = int_to_ptr.vmem [resolvable:$true] %s851_s19 }
  0x1d   :  { %v135_v35 = vrot.slane %v133_v27, 5  ;;  %v116_v37 = vor.u32 %v115_v31, %v112_v30  ;;  %v489_v38 = vrot.slane %v110_v20, 5  ;;  %v490_v39 = vrot.slane %v113_v21, 6  ;;  %v92_v57 = vld [vmem:[#allocation2 + $0x18] sm:$0xf]  ;;  %832 = vmatpush.bf16.msrb.mxu0 %v988_v59  ;;  %s853_s22 = sshll.u32 %s1307_s6, 4  ;;  %s854_s22 = int_to_ptr.hbm [resolvable:$true] %s853_s22 }
  0x1e   :  { %v421_v36 = vpack.c.b16 %v414_v29, %v413_v28  ;;  %v130_v43 = vor.u32 %v129_v34, %v126_v33  ;;  %v493_v44 = vshrl.u32 %v87_v11, 16  ;;  %v496_v45 = vrot.slane %v119_v22, 6  ;;  %v93_v63 = vld [vmem:[#allocation2 + $0x1c] sm:$0xf] }
  0x1f   :  { %v499_v46 = vrot.slane %v124_v23, 5  ;;  %v117_v48 = vrot.slane %v116_v37, 4  ;;  %v491_v49 = vor.u32 %v490_v39, %v489_v38  ;;  %v500_v50 = vrot.slane %v127_v26, 6 }
  0x20   :  { %921 = vmatmul.msk.bf16.vlgmr.msra.gmra.mxu2 %vm250_vm4, %v421_v36  ;;  %v503_v51 = vshrl.u32 %v89_v13, 16  ;;  %v131_v53 = vrot.slane %v130_v43, 4  ;;  %v495_v54 = vrot.slane %v493_v44, 5  ;;  %v506_v55 = vrot.slane %v133_v27, 6 }
  0x21   :  { %v884_v56 = vor.u32 %v1191_v41, %v1189_v40  ;;  %v122_v58 = vsel %vm1195_vm8, %v117_v48, %v121_v32  ;;  %v492_v60 = vrot.slane %v491_v49, 4  ;;  %v501_v61 = vor.u32 %v500_v50, %v499_v46  ;;  %v94_v46 = vld [vmem:[#allocation2 + $0x20] sm:$0xf] }
  0x22   :  { %v505_v62 = vrot.slane %v503_v51, 5  ;;  %v136_v1 = vsel %vm1195_vm8, %v131_v53, %v135_v35  ;;  %v226_v2 = vunpack.c.l.b16 %v122_v58  ;;  %v497_v3 = vor.u32 %v496_v45, %v495_v54  ;;  %v1223_v51 = vld [vmem:[#allocation2 + $0x20] sm:$0xf]  ;;  %v1225_v53 = vld [vmem:[#allocation2 + $0x24] sm:$0xf0] }
  0x23   :  { %v907_v4 = vrot.slane %v90_v47, 9  ;;  %v227_v5 = vunpack.c.l.b16 %v136_v1  ;;  %v502_v6 = vrot.slane %v501_v61, 4  ;;  %v386_v8 = vrot.slane %v91_v52, 5  ;;  %v96_v58 = vld [vmem:[#allocation2 + $0x28] sm:$0xf] }
  0x24   :  { %v507_v7 = vor.u32 %v506_v55, %v505_v62  ;;  %v498_v9 = vsel %vm1206_vm9, %v492_v60, %v497_v3  ;;  %v908_v10 = vrot.slane %v92_v57, 9  ;;  %v390_v11 = vrot.slane %v93_v63, 5  ;;  %v97_v62 = vld [vmem:[#allocation2 + $0x2c] sm:$0xf] }
  0x25   :  { %v138_v12 = vshrl.u32 %v90_v47, 16  ;;  %v234_v13 = vpack.c.b16 %v227_v5, %v226_v2  ;;  %v574_v15 = vunpack.c.l.b16 %v498_v9  ;;  %v387_v16 = vsel %vm1180_vm2, %v907_v4, %v386_v8 }
  0x26   :  { %v508_v14 = vsel %vm1206_vm9, %v502_v6, %v507_v7  ;;  %v391_v18 = vsel %vm1180_vm2, %v908_v10, %v390_v11  ;;  %v415_v19 = vunpack.c.l.b16 %v387_v16  ;;  %v141_v22 = vshll.u32 %v90_v47, 16  ;;  %v95_v47 = vld [vmem:[#allocation2 + $0x24] sm:$0xf] }
  0x27   :  { %v575_v17 = vunpack.c.l.b16 %v508_v14  ;;  %v140_v20 = vrot.slane %v138_v12, 4  ;;  %873 = vmatmul.msk.bf16.vlgmr.msra.gmra.mxu0 %vm250_vm4, %v234_v13  ;;  %v416_v21 = vunpack.c.l.b16 %v391_v18  ;;  %v147_v23 = vshll.u32 %v91_v52, 16 }
  0x28   :  { %v152_v24 = vshrl.u32 %v92_v57, 16  ;;  %v155_v26 = vshll.u32 %v92_v57, 16  ;;  %v161_v27 = vshll.u32 %v93_v63, 16  ;;  %v509_v28 = vrot.slane %v138_v12, 5 }
  0x29   :  { %v582_v25 = vpack.c.b16 %v575_v17, %v574_v15  ;;  %v422_v29 = vpack.c.b16 %v416_v21, %v415_v19  ;;  %v143_v30 = vrot.slane %v141_v22, 5  ;;  %v149_v31 = vrot.slane %v147_v23, 5 }
  0x2a   :  { %v154_v32 = vrot.slane %v152_v24, 4  ;;  %v157_v33 = vrot.slane %v155_v26, 5  ;;  %v163_v34 = vrot.slane %v161_v27, 5  ;;  %v510_v35 = vrot.slane %v141_v22, 6 }
  0x2b   :  { %933 = vmatmul.msk.bf16.vlgmr.msra.gmra.mxu3 %vm250_vm4, %v582_v25  ;;  %v513_v36 = vshrl.u32 %v91_v52, 16  ;;  %v144_v37 = vor.u32 %v143_v30, %v140_v20  ;;  %v516_v38 = vrot.slane %v147_v23, 6  ;;  %v519_v39 = vrot.slane %v152_v24, 5  ;;  %902 = vmatmul.msk.bf16.gmra.mxu1 %vm250_vm4, %v884_v56 }
  0x2c   :  { %v520_v40 = vrot.slane %v155_v26, 6  ;;  %v158_v41 = vor.u32 %v157_v33, %v154_v32  ;;  %v511_v43 = vor.u32 %v510_v35, %v509_v28  ;;  %v523_v45 = vshrl.u32 %v93_v63, 16 }
  0x2d   :  { %v515_v44 = vrot.slane %v513_v36, 5  ;;  %v145_v48 = vrot.slane %v144_v37, 4  ;;  %v526_v50 = vrot.slane %v161_v27, 6  ;;  %v909_v56 = vrot.slane %v94_v46, 9 }
  0x2e   :  { %v521_v49 = vor.u32 %v520_v40, %v519_v39  ;;  %v159_v52 = vrot.slane %v158_v41, 4  ;;  %v512_v54 = vrot.slane %v511_v43, 4  ;;  %v525_v57 = vrot.slane %v523_v45, 5  ;;  %v98_v41 = vld [vmem:[#allocation2 + $0x30] sm:$0xf] }
  0x2f   :  { %v517_v55 = vor.u32 %v516_v38, %v515_v44  ;;  %v150_v60 = vsel %vm1195_vm8, %v145_v48, %v149_v31  ;;  %v394_v63 = vrot.slane %v95_v47, 5  ;;  %v888_v7 = vor.u32 %v1225_v53, %v1223_v51  ;;  %v99_v48 = vld [vmem:[#allocation2 + $0x34] sm:$0xf]  ;;  %v100_v53 = vld [vmem:[#allocation2 + $0x38] sm:$0xf] }
  0x30   :  { %922 = vmatmul.msk.bf16.gmra.mxu2 %vm250_vm4, %v422_v29  ;;  %v522_v61 = vrot.slane %v521_v49, 4  ;;  %v164_v1 = vsel %vm1195_vm8, %v159_v52, %v163_v34  ;;  %v228_v2 = vunpack.c.l.b16 %v150_v60  ;;  %v527_v4 = vor.u32 %v526_v50, %v525_v57  ;;  %v101_v52 = vld [vmem:[#allocation2 + $0x3c] sm:$0xf] }
  0x31   :  { %v518_v3 = vsel %vm1206_vm9, %v512_v54, %v517_v55  ;;  %v229_v5 = vunpack.c.l.b16 %v164_v1  ;;  %v910_v8 = vrot.slane %v96_v58, 9  ;;  %v395_v10 = vsel %vm1180_vm2, %v909_v56, %v394_v63 }
  0x32   :  { %v576_v6 = vunpack.c.l.b16 %v518_v3  ;;  %v528_v9 = vsel %vm1206_vm9, %v522_v61, %v527_v4  ;;  %v398_v11 = vrot.slane %v97_v62, 5  ;;  %v166_v12 = vshrl.u32 %v94_v46, 16 }
  0x33   :  { %v235_v13 = vpack.c.b16 %v229_v5, %v228_v2  ;;  %v577_v14 = vunpack.c.l.b16 %v528_v9  ;;  %v169_v15 = vshll.u32 %v94_v46, 16  ;;  %v175_v16 = vshll.u32 %v95_v47, 16 }
  0x34   :  { %v399_v17 = vsel %vm1180_vm2, %v910_v8, %v398_v11  ;;  %v168_v18 = vrot.slane %v166_v12, 4  ;;  %v180_v19 = vshrl.u32 %v96_v58, 16  ;;  %v183_v20 = vshll.u32 %v96_v58, 16 }
  0x35   :  { %v583_v21 = vpack.c.b16 %v577_v14, %v576_v6  ;;  %v417_v22 = vunpack.c.l.b16 %v395_v10  ;;  %v418_v23 = vunpack.c.l.b16 %v399_v17  ;;  %v171_v24 = vrot.slane %v169_v15, 5 }
  0x36   :  { %v182_v25 = vrot.slane %v180_v19, 4  ;;  %v185_v26 = vrot.slane %v183_v20, 5  ;;  %v189_v27 = vshll.u32 %v97_v62, 16  ;;  %v529_v28 = vrot.slane %v166_v12, 5 }
  0x37   :  { %874 = vmatmul.msk.bf16.gmra.mxu0 %vm250_vm4, %v235_v13  ;;  %v172_v29 = vor.u32 %v171_v24, %v168_v18  ;;  %v177_v30 = vrot.slane %v175_v16, 5  ;;  %v530_v31 = vrot.slane %v169_v15, 6  ;;  %v533_v32 = vshrl.u32 %v95_v47, 16 }
  0x38   :  { %v186_v33 = vor.u32 %v185_v26, %v182_v25  ;;  %v191_v34 = vrot.slane %v189_v27, 5  ;;  %v536_v35 = vrot.slane %v175_v16, 6  ;;  %v539_v36 = vrot.slane %v180_v19, 5 }
  0x39   :  { %v173_v37 = vrot.slane %v172_v29, 4  ;;  %v531_v38 = vor.u32 %v530_v31, %v529_v28  ;;  %v535_v39 = vrot.slane %v533_v32, 5  ;;  %v540_v40 = vrot.slane %v183_v20, 6  ;;  %v891_v28 = vld [vmem:[#allocation2 + $0x30] sm:$0xf] }
  0x3a   :  { %v423_v43 = vpack.c.b16 %v418_v23, %v417_v22  ;;  %v187_v44 = vrot.slane %v186_v33, 4  ;;  %v543_v45 = vshrl.u32 %v97_v62, 16  ;;  %v546_v46 = vrot.slane %v189_v27, 6  ;;  %v972_v29 = vld [vmem:[#allocation2 + $0x34] sm:$0xf0] }
  0x3b   :  { %934 = vmatmul.msk.bf16.gmra.mxu3 %vm250_vm4, %v583_v21  ;;  %v178_v49 = vsel %vm1195_vm8, %v173_v37, %v177_v30  ;;  %v532_v47 = vrot.slane %v531_v38, 4  ;;  %v537_v50 = vor.u32 %v536_v35, %v535_v39  ;;  %v541_v51 = vor.u32 %v540_v40, %v539_v36  ;;  %903 = vmatmul.msk.bf16.gmra.mxu1 %vm250_vm4, %v888_v7 }
  0x3c   :  { %v192_v54 = vsel %vm1195_vm8, %v187_v44, %v191_v34  ;;  %v545_v55 = vrot.slane %v543_v45, 5  ;;  %v911_v57 = vrot.slane %v98_v41, 9  ;;  %v230_v58 = vunpack.c.l.b16 %v178_v49 }
  0x3d   :  { %v231_v60 = vunpack.c.l.b16 %v192_v54  ;;  %v542_v61 = vrot.slane %v541_v51, 4  ;;  %v402_v62 = vrot.slane %v99_v48, 5  ;;  %v538_v56 = vsel %vm1206_vm9, %v532_v47, %v537_v50 }
  0x3e   :  { %v547_v63 = vor.u32 %v546_v46, %v545_v55  ;;  %v912_v1 = vrot.slane %v100_v53, 9  ;;  %v406_v2 = vrot.slane %v101_v52, 5  ;;  %v194_v3 = vshrl.u32 %v98_v41, 16 }
  0x3f   :  { %v197_v4 = vshll.u32 %v98_v41, 16  ;;  %v403_v6 = vsel %vm1180_vm2, %v911_v57, %v402_v62  ;;  %v236_v7 = vpack.c.b16 %v231_v60, %v230_v58  ;;  %v578_v8 = vunpack.c.l.b16 %v538_v56 }
  0x40   :  { %923 = vmatmul.msk.bf16.gmra.mxu2 %vm250_vm4, %v423_v43  ;;  %v548_v5 = vsel %vm1206_vm9, %v542_v61, %v547_v63  ;;  %v196_v9 = vrot.slane %v194_v3, 4  ;;  %v407_v12 = vsel %vm1180_vm2, %v912_v1, %v406_v2  ;;  %v208_v13 = vshrl.u32 %v100_v53, 16 }
  0x41   :  { %v199_v10 = vrot.slane %v197_v4, 5  ;;  %v579_v11 = vunpack.c.l.b16 %v548_v5  ;;  %v211_v14 = vshll.u32 %v100_v53, 16  ;;  %v419_v15 = vunpack.c.l.b16 %v403_v6 }
  0x42   :  { %v203_v16 = vshll.u32 %v99_v48, 16  ;;  %v217_v17 = vshll.u32 %v101_v52, 16  ;;  %v549_v18 = vrot.slane %v194_v3, 5  ;;  %v210_v20 = vrot.slane %v208_v13, 4 }
  0x43   :  { %v200_v19 = vor.u32 %v199_v10, %v196_v9  ;;  %v213_v21 = vrot.slane %v211_v14, 5  ;;  %v550_v22 = vrot.slane %v197_v4, 6  ;;  %v420_v23 = vunpack.c.l.b16 %v407_v12  ;;  %v987_v9 = vld [vmem:[#allocation7 + $0x30] sm:$0xff] }
  0x44   :  { %v205_v24 = vrot.slane %v203_v16, 5  ;;  %v553_v25 = vshrl.u32 %v99_v48, 16  ;;  %v559_v26 = vrot.slane %v208_v13, 5  ;;  %v584_v27 = vpack.c.b16 %v579_v11, %v578_v8  ;;  %833 = vmatpush.bf16.msrb.mxu0 %v987_v9 }
  0x45   :  { %v214_v30 = vor.u32 %v213_v21, %v210_v20  ;;  %v560_v0 = vrot.slane %v211_v14, 6  ;;  %v563_v31 = vshrl.u32 %v101_v52, 16  ;;  %v551_v32 = vor.u32 %v550_v22, %v549_v18  ;;  %v986_v18 = vld [vmem:[#allocation7 + $0x28] sm:$0xff] }
  0x46   :  { %v555_v33 = vrot.slane %v553_v25, 5  ;;  %v556_v34 = vrot.slane %v203_v16, 6  ;;  %v566_v35 = vrot.slane %v217_v17, 6  ;;  %v201_v36 = vrot.slane %v200_v19, 4 }
  0x47   :  { %875 = vmatmul.msk.bf16.gmra.mxu0 %vm250_vm4, %v236_v7  ;;  %v215_v37 = vrot.slane %v214_v30, 4  ;;  %v219_v38 = vrot.slane %v217_v17, 5  ;;  %v561_v39 = vor.u32 %v560_v0, %v559_v26  ;;  %v892_v40 = vor.u32 %v972_v29, %v891_v28  ;;  %v1275_v28 = vld [vmem:[%s1304_s3] ss:$0 sm:$0xff] }
  0x48   :  { %v565_v41 = vrot.slane %v563_v31, 5  ;;  %v424_v43 = vpack.c.b16 %v420_v23, %v419_v15  ;;  %v552_v44 = vrot.slane %v551_v32, 4  ;;  %v557_v45 = vor.u32 %v556_v34, %v555_v33  ;;  %834 = vmatpush.bf16.msrb.mxu0 %v986_v18  ;;  %v985_v33 = vld [vmem:[#allocation7 + $0x20] sm:$0xff] }
  0x49   :  { %v562_v46 = vrot.slane %v561_v39, 4  ;;  %v206_v49 = vsel %vm1195_vm8, %v201_v36, %v205_v24  ;;  %v220_v47 = vsel %vm1195_vm8, %v215_v37, %v219_v38  ;;  %vm770_vm11 = vcmask 1042434  }
  0x4a   :  { %v567_v48 = vor.u32 %v566_v35, %v565_v41  ;;  %v232_v50 = vunpack.c.l.b16 %v206_v49  ;;  %v233_v51 = vunpack.c.l.b16 %v220_v47  ;;  %v558_v53 = vsel %vm1206_vm9, %v552_v44, %v557_v45  ;;  %v984_v44 = vld [vmem:[#allocation7 + $0x18] sm:$0xff]  ;;  %v1282_v49 = vld [vmem:[#allocation8] sm:$0xff] }
  0x4b   :  { %935 = vmatmul.msk.bf16.gmra.mxu3 %vm250_vm4, %v584_v27  ;;  %904 = vmatmul.msk.bf16.gmra.mxu1 %vm250_vm4, %v892_v40  ;;  %v580_v54 = vunpack.c.l.b16 %v558_v53  ;;  %vm772_vm12 = vcmask 1043459   ;;  %vm774_vm13 = vcmask 1044484   ;;  %vm776_vm14 = vcmask 1045509  }
  0x4c   :  { %v568_v52 = vsel %vm1206_vm9, %v562_v46, %v567_v48  ;;  %v237_v57 = vpack.c.b16 %v233_v51, %v232_v50  ;;  %835 = vmatpush.bf16.msrb.mxu0 %v985_v33  ;;  %vm778_vm15 = vcmask 1046534   ;;  %vm780_vm0 = vcmask 1047559  }
  0x4d   :  { %v581_v55 = vunpack.c.l.b16 %v568_v52  ;;  %v983_v52 = vld [vmem:[#allocation7 + $0x10] sm:$0xff] }
  0x4f   :  { %v585_v58 = vpack.c.b16 %v581_v55, %v580_v54 }
  0x50   :  { %924 = vmatmul.msk.bf16.gmra.mxu2 %vm250_vm4, %v424_v43  ;;  %836 = vmatpush.bf16.msrb.mxu0 %v984_v44 }
  0x54   :  { %837 = vmatpush.bf16.msrb.mxu0 %v983_v52 }
  0x57   :  { %876 = vmatmul.msk.bf16.gmra.mxu0 %vm250_vm4, %v237_v57 }
  0x5b   :  { %936 = vmatmul.msk.bf16.gmra.mxu3 %vm250_vm4, %v585_v58 }
  0x98   :  { %v345_v42 = vpop.f32.mrf.mxu1 }
  0xa0   :  { %v347_v61 = vpop.f32.mrf.mxu1 }
  0xa3   :  { %v458_v60 = vpop.f32.mrf.mxu2 }
  0xa4   :  { %v272_v62 = vpop.f32.mrf.mxu0 }
  0xa5   :  { %v346_v13 = vadd.f32 %v345_v42, %v272_v62  ;;  %v982_v62 = vld [vmem:[#allocation7 + $0x8] sm:$0xff] }
  0xa6   :  { %838 = vmatpush.bf16.msrb.mxu0 %v982_v62 }
  0xa7   :  { %v478_v21 = vadd.f32 %v458_v60, %v346_v13 }
  0xa8   :  { %v350_v2 = vpop.f32.mrf.mxu1 }
  0xab   :  { %v460_v56 = vpop.f32.mrf.mxu2 }
  0xac   :  { %v274_v63 = vpop.f32.mrf.mxu0 }
  0xad   :  { %v348_v14 = vadd.f32 %v347_v61, %v274_v63 }
  0xae   :  { %v619_v1 = vpop.f32.mrf.mxu3 }
  0xaf   :  { %v479_v22 = vadd.f32 %v460_v56, %v348_v14  ;;  %v639_v27 = vadd.f32 %v619_v1, %v478_v21 }
  0xb0   :  { %v352_v6 = vpop.f32.mrf.mxu1 }
  0xb1   :  { %v651_v37 = vadd.f32 %v1275_v28, %v639_v27 }
  0xb3   :  { %v463_v3 = vpop.f32.mrf.mxu2  ;;  %v659_v46 = vmax.f32 %v651_v37, 0.0 }
  0xb4   :  { %v277_v4 = vpop.f32.mrf.mxu0 }
  0xb5   :  { %v351_v11 = vadd.f32 %v350_v2, %v277_v4  ;;  %v668_v58 = vadd.f32 %v1282_v49, %v659_v46 }
  0xb6   :  { %v621_v5 = vpop.f32.mrf.mxu3 }
  0xb7   :  { %v480_v19 = vadd.f32 %v463_v3, %v351_v11  ;;  %v640_v24 = vadd.f32 %v621_v5, %v479_v22  ;;  %v676_v4 = vrot.slane %v668_v58, 4 }
  0xb8   :  { %v355_v12 = vpop.f32.mrf.mxu1 }
  0xb9   :  { %v652_v31 = vadd.f32 %v1275_v28, %v640_v24  ;;  %v677_v14 = vmax.f32 %v668_v58, %v676_v4 }
  0xbb   :  { %v465_v7 = vpop.f32.mrf.mxu2  ;;  %v660_v40 = vmax.f32 %v652_v31, 0.0 }
  0xbc   :  { %v279_v8 = vpop.f32.mrf.mxu0 }
  0xbd   :  { %v353_v16 = vadd.f32 %v352_v6, %v279_v8  ;;  %v669_v50 = vadd.f32 %v1282_v49, %v660_v40 }
  0xbe   :  { %v624_v10 = vpop.f32.mrf.mxu3 }
  0xbf   :  { %v481_v25 = vadd.f32 %v465_v7, %v353_v16  ;;  %v641_v26 = vadd.f32 %v624_v10, %v480_v19  ;;  %v682_v1 = vrot.slane %v669_v50, 4  ;;  %v981_v7 = vld [vmem:[#allocation7] sm:$0xff] }
  0xc0   :  { %v357_v0 = vpop.f32.mrf.mxu1  ;;  %839 = vmatpush.bf16.msrb.mxu0 %v981_v7 }
  0xc1   :  { %v653_v34 = vadd.f32 %v1275_v28, %v641_v26  ;;  %v683_v9 = vmax.f32 %v669_v50, %v682_v1  ;;  %v678_v26 = vrot.slane %v677_v14, 2 }
  0xc3   :  { %v468_v15 = vpop.f32.mrf.mxu2  ;;  %v661_v45 = vmax.f32 %v653_v34, 0.0 }
  0xc4   :  { %v282_v17 = vpop.f32.mrf.mxu0 }
  0xc5   :  { %v356_v23 = vadd.f32 %v355_v12, %v282_v17  ;;  %v670_v54 = vadd.f32 %v1282_v49, %v661_v45 }
  0xc6   :  { %v626_v20 = vpop.f32.mrf.mxu3 }
  0xc7   :  { %v642_v29 = vadd.f32 %v626_v20, %v481_v25  ;;  %v482_v30 = vadd.f32 %v468_v15, %v356_v23  ;;  %v688_v3 = vrot.slane %v670_v54, 4  ;;  %v684_v20 = vrot.slane %v683_v9, 2 }
  0xc8   :  { %v360_v55 = vpop.f32.mrf.mxu1 }
  0xc9   :  { %v654_v38 = vadd.f32 %v1275_v28, %v642_v29  ;;  %v689_v11 = vmax.f32 %v670_v54, %v688_v3 }
  0xcb   :  { %v470_v36 = vpop.f32.mrf.mxu2  ;;  %v662_v48 = vmax.f32 %v654_v38, 0.0  ;;  %v690_v24 = vrot.slane %v689_v11, 2 }
  0xcc   :  { %v284_v32 = vpop.f32.mrf.mxu0 }
  0xcd   :  { %v358_v43 = vadd.f32 %v357_v0, %v284_v32  ;;  %v671_v42 = vadd.f32 %v1282_v49, %v662_v48  ;;  %v685_v0 = vmax.f32 %v683_v9, %v684_v20  ;;  %v691_v34 = vmax.f32 %v689_v11, %v690_v24 }
  0xce   :  { %v629_v35 = vpop.f32.mrf.mxu3 }
  0xcf   :  { %v643_v39 = vadd.f32 %v629_v35, %v482_v30  ;;  %v483_v51 = vadd.f32 %v470_v36, %v358_v43  ;;  %v694_v59 = vrot.slane %v671_v42, 4  ;;  %v679_v36 = vmax.f32 %v677_v14, %v678_v26 }
  0xd0   :  { %v362_v19 = vpop.f32.mrf.mxu1  ;;  %v692_v46 = vrot.slane %v691_v34, 1 }
  0xd1   :  { %v655_v41 = vadd.f32 %v1275_v28, %v643_v39  ;;  %v695_v15 = vmax.f32 %v671_v42, %v694_v59  ;;  %v680_v48 = vrot.slane %v679_v36, 1 }
  0xd2   :  { %v693_v58 = vmax.f32 %v691_v34, %v692_v46 }
  0xd3   :  { %v663_v47 = vmax.f32 %v655_v41, 0.0  ;;  %v473_v63 = vpop.f32.mrf.mxu2  ;;  %v696_v27 = vrot.slane %v695_v15, 2  ;;  %v686_v41 = vrot.slane %v685_v0, 1  ;;  %v681_v42 = vmax.f32 %v679_v36, %v680_v48 }
  0xd4   :  { %v287_v53 = vpop.f32.mrf.mxu0 }
  0xd5   :  { %v361_v61 = vadd.f32 %v360_v55, %v287_v53  ;;  %v672_v56 = vadd.f32 %v1282_v49, %v663_v47  ;;  %v697_v37 = vmax.f32 %v695_v15, %v696_v27  ;;  %v687_v52 = vmax.f32 %v685_v0, %v686_v41 }
  0xd6   :  { %v631_v57 = vpop.f32.mrf.mxu3  ;;  %v724_v4 = vpack.c.bf16 %v681_v42, %v681_v42 }
  0xd7   :  { %v644_v60 = vadd.f32 %v631_v57, %v483_v51  ;;  %v484_v6 = vadd.f32 %v473_v63, %v361_v61  ;;  %v700_v8 = vrot.slane %v672_v56, 4  ;;  %v698_v47 = vrot.slane %v697_v37, 1 }
  0xd8   :  { %v725_v63 = vpack.c.bf16 %v687_v52, %v687_v52  ;;  %v760_v11 = vunpack.c.l.b16 %v724_v4 }
  0xd9   :  { %v656_v2 = vadd.f32 %v1275_v28, %v644_v60  ;;  %v701_v18 = vmax.f32 %v672_v56, %v700_v8  ;;  %v699_v60 = vmax.f32 %v697_v37, %v698_v47 }
  0xda   :  { %v761_v7 = vunpack.c.l.b16 %v725_v63 }
  0xdb   :  { %v664_v5 = vmax.f32 %v656_v2, 0.0  ;;  %v475_v25 = vpop.f32.mrf.mxu2  ;;  %v702_v30 = vrot.slane %v701_v18, 2  ;;  %v726_v2 = vpack.c.bf16 %v693_v58, %v693_v58  ;;  %v727_v59 = vpack.c.bf16 %v699_v60, %v699_v60 }
  0xdc   :  { %v289_v13 = vpop.f32.mrf.mxu0  ;;  %v769_v15 = vsel %vm768_vm10, %v761_v7, %v760_v11 }
  0xdd   :  { %v673_v10 = vadd.f32 %v1282_v49, %v664_v5  ;;  %v363_v23 = vadd.f32 %v362_v19, %v289_v13  ;;  %v703_v40 = vmax.f32 %v701_v18, %v702_v30 }
  0xde   :  { %v634_v12 = vpop.f32.mrf.mxu3 }
  0xdf   :  { %v706_v16 = vrot.slane %v673_v10, 4  ;;  %v645_v17 = vadd.f32 %v634_v12, %v484_v6  ;;  %v485_v33 = vadd.f32 %v475_v25, %v363_v23  ;;  %v704_v53 = vrot.slane %v703_v40, 1 }
  0xe0   :  { %v763_v12 = vunpack.c.l.b16 %v727_v59 }
  0xe1   :  { %v707_v21 = vmax.f32 %v673_v10, %v706_v16  ;;  %v657_v22 = vadd.f32 %v1275_v28, %v645_v17  ;;  %v705_v56 = vmax.f32 %v703_v40, %v704_v53 }
  0xe3   :  { %v665_v29 = vmax.f32 %v657_v22, 0.0  ;;  %v708_v31 = vrot.slane %v707_v21, 2  ;;  %v728_v6 = vpack.c.bf16 %v705_v56, %v705_v56 }
  0xe5   :  { %v674_v32 = vadd.f32 %v1282_v49, %v665_v29  ;;  %v709_v43 = vmax.f32 %v707_v21, %v708_v31  ;;  %v764_v14 = vunpack.c.l.b16 %v728_v6  ;;  %v997_v29 = vld [vmem:[%s1305_s4] ss:$0 sm:$0xff] }
  0xe6   :  { %v636_v35 = vpop.f32.mrf.mxu3 }
  0xe7   :  { %v712_v38 = vrot.slane %v674_v32, 4  ;;  %v646_v39 = vadd.f32 %v636_v35, %v485_v33  ;;  %v710_v54 = vrot.slane %v709_v43, 1 }
  0xe9   :  { %v713_v44 = vmax.f32 %v674_v32, %v712_v38  ;;  %v658_v45 = vadd.f32 %v1275_v28, %v646_v39  ;;  %v711_v1 = vmax.f32 %v709_v43, %v710_v54 }
  0xeb   :  { %v714_v50 = vrot.slane %v713_v44, 2  ;;  %v666_v51 = vmax.f32 %v658_v45, 0.0  ;;  %v729_v8 = vpack.c.bf16 %v711_v1, %v711_v1 }
  0xed   :  { %v715_v55 = vmax.f32 %v713_v44, %v714_v50  ;;  %v675_v57 = vadd.f32 %v1282_v49, %v666_v51  ;;  %v762_v49 = vunpack.c.l.b16 %v726_v2  ;;  %v765_v16 = vunpack.c.l.b16 %v729_v8 }
  0xef   :  { %v716_v61 = vrot.slane %v715_v55, 1  ;;  %v718_v62 = vrot.slane %v675_v57, 4  ;;  %v771_v19 = vsel %vm770_vm11, %v762_v49, %v769_v15 }
  0xf0   :  { %v773_v21 = vsel %vm772_vm12, %v763_v12, %v771_v19 }
  0xf1   :  { %v719_v28 = vmax.f32 %v675_v57, %v718_v62  ;;  %v717_v3 = vmax.f32 %v715_v55, %v716_v61  ;;  %v775_v22 = vsel %vm774_vm13, %v764_v14, %v773_v21 }
  0xf2   :  { %v777_v24 = vsel %vm776_vm14, %v765_v16, %v775_v22 }
  0xf3   :  { %v720_v5 = vrot.slane %v719_v28, 2  ;;  %v730_v10 = vpack.c.bf16 %v717_v3, %v717_v3 }
  0xf5   :  { %v721_v9 = vmax.f32 %v719_v28, %v720_v5  ;;  %v766_v18 = vunpack.c.l.b16 %v730_v10 }
  0xf7   :  { %v722_v13 = vrot.slane %v721_v9, 1  ;;  %v779_v25 = vsel %vm778_vm15, %v766_v18, %v777_v24 }
  0xf9   :  { %v723_v17 = vmax.f32 %v721_v9, %v722_v13 }
  0xfb   :  { %v731_v20 = vpack.c.bf16 %v723_v17, %v723_v17 }
  0xfd   :  { %v767_v23 = vunpack.c.l.b16 %v731_v20 }
  0xff   :  { %v781_v26 = vsel %vm780_vm0, %v767_v23, %v779_v25 }
 0x100   :  { %v782_v27 = vpack.c.b16 %v781_v26, %v781_v26 }
 0x102   :  { %840 = vmatmul.bf16.vlgmr.msrb.gmra.mxu0 %v782_v27 }
 0x17f   :  { %v841_v30 = vpop.f32.mrf.mxu0 }
 0x180   :  { %v842_v0 = vadd.f32 %v997_v29, %v841_v30 }
 0x182   :  { %845 = vst [vmem:[#allocation10] sm:$0xff] %v842_v0 }
 0x183   :  { %856 = dma.vmem_to_hbm [thread:$0]  %s852_s19, 128, %s854_s22, [#allocation4]  }
 0x187   :  { %v843_v31 = vpop.f32.mrf.mxu0 }
 0x188   :  { %1124 = dma.done.wait [#allocation4], 128  }
 0x189   :  { %1125 = vsyncadd [#allocation4], 4294967168 }
 0x18a   :  { %861 = vsyncpa [#allocation3], 1 }
 0x18b   :  { %862 = vsyncpa [#allocation6], 1 }
 0x18c   :  { %863 = vsyncpa [#allocation9], 1 }
 0x18d   :  { %864 = vsyncpa [#allocation4], 1 }

</bundles_post_ra>
